<compile_context>
chip_gen: v6e
topology: v6e:2x2x1
jax: 0.10.0
libtpu: 0.0.40
codegen_flags: <defaults>
</compile_context>

<pallas_src>
import functools

import jax
import jax.numpy as jnp
from jax.experimental import pallas as pl
from jax.experimental.pallas import tpu as pltpu


_LANE = 128
_MAX_ROW_TILE = 256
_MAX_LANE_TILE = 4096                      # at most 32 lane chunks per block
_INPUT_VMEM_BUDGET = 4 * 1024 * 1024       # combined pred+target bytes / block


def _round_down(x, m):
    return (x // m) * m


def _choose_tiles(B, L, itemsizes):
    """Pick (tb, tl) row / lane tiles.

    Blocks target ~2-4 MiB of combined input per grid step (HBM roofline is
    saturated at that size); ragged last blocks are allowed so no divisor
    search is needed. tb is rounded to the packed-sublane granularity of the
    narrowest input dtype and kept small enough that the rows axis has at
    least two blocks (v7x megacore) whenever B allows it.
    """
    gran = max(8, *(32 // b for b in itemsizes))      # f32->8, bf16->16, i8->32
    bytes_per_elem = sum(itemsizes)

    if B <= gran:
        tb = B                                        # single full-row block
    else:
        tb = max(gran, _round_down(min(_MAX_ROW_TILE, B), gran))
        if -(-B // tb) < 2:
            # Guarantee >= 2 row blocks so "parallel" can shard across TCs.
            half = _round_down((B + 1) // 2, gran)
            if gran <= half < B:
                tb = half

    max_block_elems = max(_INPUT_VMEM_BUDGET // bytes_per_elem, tb * _LANE)
    tl_cap = max(_LANE, _round_down(max_block_elems // tb, _LANE))
    tl_cap = min(tl_cap, _MAX_LANE_TILE)

    if L < _LANE:
        tl = L                                        # full (sub-128) lane dim
    else:
        tl = min(tl_cap, _round_down(L, _LANE))       # multiple of 128, <= L
    return tb, tl


def _iou_reduce_kernel(pred_ref, targ_ref, inter_ref, total_ref,
                       inter_acc, total_acc, *,
                       tl, L, chunk_w, apply_sigmoid, mask_lanes):
    # pred_ref/targ_ref: (tb, tl) input tile (native dtypes).
    # inter_ref/total_ref: (tb, 1) f32 outputs, written once per row block.
    # inter_acc/total_acc: (tb, chunk_w) f32 VMEM scratch accumulators.
    k = pl.program_id(1)

    @pl.when(k == 0)
    def _init():
        inter_acc[...] = jnp.zeros_like(inter_acc)
        total_acc[...] = jnp.zeros_like(total_acc)

    n_chunks = tl // chunk_w
    fold_i = None
    fold_t = None
    for c in range(n_chunks):
        lo, hi = c * chunk_w, (c + 1) * chunk_w
        p = pred_ref[:, lo:hi].astype(jnp.float32)
        t = targ_ref[:, lo:hi].astype(jnp.float32)
        if apply_sigmoid:
            # sigmoid(x) == 0.5 * (tanh(0.5*x) + 1): one EUP push per vreg.
            p = 0.5 * (jnp.tanh(0.5 * p) + 1.0)
        if mask_lanes:
            col = (k * tl + lo
                   + jax.lax.broadcasted_iota(jnp.int32, p.shape, 1))
            valid = col < L
            p = jnp.where(valid, p, 0.0)
            t = jnp.where(valid, t, 0.0)
        pi = p * t
        ps = p + t
        fold_i = pi if fold_i is None else fold_i + pi
        fold_t = ps if fold_t is None else fold_t + ps

    inter_acc[...] += fold_i
    total_acc[...] += fold_t

    @pl.when(k == pl.num_programs(1) - 1)
    def _finalize():
        # Only two cross-lane (XLU) reductions + narrow stores per row block.
        inter_ref[...] = jnp.sum(inter_acc[...], axis=-1, keepdims=True)
        total_ref[...] = jnp.sum(total_acc[...], axis=-1, keepdims=True)


@functools.partial(jax.jit, static_argnames=("smooth",))
def iou_loss(pred, target, smooth=1e-6):
    """IoU loss matching PyTorch IoULoss.forward semantics.

    pred, target: (N, C, H, W). Sigmoid is applied to pred inside the kernel
    unless pred is boolean (PyTorch skips it for bool preds).
    Returns a scalar: 1 - mean over (N, C) of (inter + smooth)/(union + smooth).
    """
    N, C, H, W = pred.shape
    B = N * C
    L = H * W

    pred2d = pred.reshape(B, L)
    targ2d = target.reshape(B, L)

    apply_sigmoid = pred2d.dtype != jnp.bool_
    if pred2d.dtype == jnp.bool_:
        # TODO(synk): a zero-copy bool->int8 bitcast would avoid this extra
        # HBM pass, but bool bitcasts are not portable across backends.
        pred2d = pred2d.astype(jnp.int8)
    if targ2d.dtype == jnp.bool_:
        targ2d = targ2d.astype(jnp.int8)

    itemsizes = (pred2d.dtype.itemsize, targ2d.dtype.itemsize)
    tb, tl = _choose_tiles(B, L, itemsizes)
    chunk_w = _LANE if tl % _LANE == 0 else tl
    mask_lanes = (L % tl) != 0
    grid = (pl.cdiv(B, tb), pl.cdiv(L, tl))

    kernel = functools.partial(
        _iou_reduce_kernel, tl=tl, L=L, chunk_w=chunk_w,
        apply_sigmoid=apply_sigmoid, mask_lanes=mask_lanes)

    in_spec = pl.BlockSpec((tb, tl), lambda i, k: (i, k))
    out_spec = pl.BlockSpec((tb, 1), lambda i, k: (i, 0))
    in_bytes = sum(itemsizes)

    inter, total = pl.pallas_call(
        kernel,
        out_shape=(
            jax.ShapeDtypeStruct((B, 1), jnp.float32),   # sum(p*t)
            jax.ShapeDtypeStruct((B, 1), jnp.float32),   # sum(p) + sum(t)
        ),
        grid_spec=pltpu.PrefetchScalarGridSpec(
            num_scalar_prefetch=0,
            grid=grid,
            in_specs=[in_spec, in_spec],
            out_specs=[out_spec, out_spec],
            scratch_shapes=[
                pltpu.VMEM((tb, chunk_w), jnp.float32),
                pltpu.VMEM((tb, chunk_w), jnp.float32),
            ],
        ),
        compiler_params=pltpu.CompilerParams(
            dimension_semantics=("parallel", "arbitrary"),
            vmem_limit_bytes=32 * 1024 * 1024,
        ),
        cost_estimate=pl.CostEstimate(
            flops=6 * B * L,
            transcendentals=(B * L) if apply_sigmoid else 0,
            bytes_accessed=B * L * in_bytes + 2 * B * 4,
        ),
    )(pred2d, targ2d)

    inter = inter[:, 0]
    total = total[:, 0]
    union = total - inter
    iou = (inter + smooth) / (union + smooth)
    return 1.0 - jnp.mean(iou)


def _reference_iou_loss(pred, target, smooth=1e-6):
    p = pred.astype(jnp.float32)
    if pred.dtype != jnp.bool_:
        p = jax.nn.sigmoid(p)
    t = target.astype(jnp.float32)
    inter = jnp.sum(p * t, axis=(2, 3))
    total = jnp.sum(p, axis=(2, 3)) + jnp.sum(t, axis=(2, 3))
    union = total - inter
    iou = (inter + smooth) / (union + smooth)
    return 1.0 - jnp.mean(iou)


if __name__ == "__main__":
    key = jax.random.PRNGKey(0)
    k1, k2, k3, k4 = jax.random.split(key, 4)

    # Primary shape: aligned case (B = 8 rows, L = 256 lanes).
    N, C, H, W = 2, 4, 16, 16
    pred = jax.random.normal(k1, (N, C, H, W), dtype=jnp.float32)
    target = (jax.random.uniform(k2, (N, C, H, W)) > 0.5).astype(jnp.float32)
    loss = jax.block_until_ready(iou_loss(pred, target))
    ref = jax.block_until_ready(_reference_iou_loss(pred, target))
    assert jnp.allclose(loss, ref, atol=1e-5, rtol=1e-5), (loss, ref)

    # Ragged case: B = 9 rows, L = 160 lanes exercises the in-kernel tail
    # masking (no wrapper-side padding pass anymore).
    N2, C2, H2, W2 = 3, 3, 16, 10
    pred2 = jax.random.normal(k3, (N2, C2, H2, W2), dtype=jnp.float32)
    target2 = (jax.random.uniform(k4, (N2, C2, H2, W2)) > 0.5).astype(jnp.float32)
    loss2 = jax.block_until_ready(iou_loss(pred2, target2))
    ref2 = jax.block_until_ready(_reference_iou_loss(pred2, target2))
    assert jnp.allclose(loss2, ref2, atol=1e-5, rtol=1e-5), (loss2, ref2)

    print("KERNEL_OK")
</pallas_src>

<mosaic_0001>
module attributes {stable_mosaic.version = 11 : i64} {
  func.func @_iou_reduce_kernel(%arg0: i32, %arg1: i32, %arg2: memref<8x256xf32, #tpu.memory_space<vmem>>, %arg3: memref<8x256xf32, #tpu.memory_space<vmem>>, %arg4: memref<8x1xf32, #tpu.memory_space<vmem>>, %arg5: memref<8x1xf32, #tpu.memory_space<vmem>>, %arg6: memref<8x128xf32, #tpu.memory_space<vmem>>, %arg7: memref<8x128xf32, #tpu.memory_space<vmem>>) attributes {dimension_semantics = [#tpu.dimension_semantics<parallel>, #tpu.dimension_semantics<arbitrary>], iteration_bounds = array<i64: 1, 1>, scalar_prefetch = 0 : i64, scratch_operands = 2 : i64, tpu.core_type = #tpu.core_type<tc>, window_params = [{transform_indices = @transform_0, window_bounds = array<i64: 8, 256>}, {transform_indices = @transform_1, window_bounds = array<i64: 8, 256>}, {transform_indices = @transform_2, window_bounds = array<i64: 8, 1>}, {transform_indices = @transform_3, window_bounds = array<i64: 8, 1>}]} {
    %c0_i32 = arith.constant 0 : i32
    %0 = arith.cmpi eq, %arg1, %c0_i32 : i32
    %1 = arith.extui %0 : i1 to i32
    %c0_i32_0 = arith.constant 0 : i32
    %2 = arith.cmpi ne, %1, %c0_i32_0 : i32
    scf.if %2 {
      %cst_22 = arith.constant 0.000000e+00 : f32
      %36 = vector.broadcast %cst_22 : f32 to vector<8x128xf32>
      %c0_23 = arith.constant 0 : index
      %c0_24 = arith.constant 0 : index
      %37 = vector.load %arg6[%c0_23, %c0_24] : memref<8x128xf32, #tpu.memory_space<vmem>>, vector<8x128xf32>
      tpu.vector_store %arg6[%c0_23, %c0_24], %36 {strides = array<i32>} : memref<8x128xf32, #tpu.memory_space<vmem>>, vector<8x128xf32>,
      %cst_25 = arith.constant 0.000000e+00 : f32
      %38 = vector.broadcast %cst_25 : f32 to vector<8x128xf32>
      %c0_26 = arith.constant 0 : index
      %c0_27 = arith.constant 0 : index
      %39 = vector.load %arg7[%c0_26, %c0_27] : memref<8x128xf32, #tpu.memory_space<vmem>>, vector<8x128xf32>
      tpu.vector_store %arg7[%c0_26, %c0_27], %38 {strides = array<i32>} : memref<8x128xf32, #tpu.memory_space<vmem>>, vector<8x128xf32>,
    } else {
    }
    %c0 = arith.constant 0 : index
    %c0_1 = arith.constant 0 : index
    %3 = vector.load %arg2[%c0, %c0_1] : memref<8x256xf32, #tpu.memory_space<vmem>>, vector<8x128xf32>
    %c0_2 = arith.constant 0 : index
    %c0_3 = arith.constant 0 : index
    %4 = vector.load %arg3[%c0_2, %c0_3] : memref<8x256xf32, #tpu.memory_space<vmem>>, vector<8x128xf32>
    %cst = arith.constant 5.000000e-01 : f32
    %5 = vector.broadcast %cst : f32 to vector<8x128xf32>
    %6 = arith.mulf %5, %3 : vector<8x128xf32>
    %7 = math.tanh %6 : vector<8x128xf32>
    %cst_4 = arith.constant 1.000000e+00 : f32
    %8 = vector.broadcast %cst_4 : f32 to vector<8x128xf32>
    %9 = arith.addf %7, %8 : vector<8x128xf32>
    %cst_5 = arith.constant 5.000000e-01 : f32
    %10 = vector.broadcast %cst_5 : f32 to vector<8x128xf32>
    %11 = arith.mulf %10, %9 : vector<8x128xf32>
    %12 = arith.mulf %11, %4 : vector<8x128xf32>
    %13 = arith.addf %11, %4 : vector<8x128xf32>
    %c0_6 = arith.constant 0 : index
    %c128 = arith.constant 128 : index
    %14 = vector.load %arg2[%c0_6, %c128] : memref<8x256xf32, #tpu.memory_space<vmem>>, vector<8x128xf32>
    %c0_7 = arith.constant 0 : index
    %c128_8 = arith.constant 128 : index
    %15 = vector.load %arg3[%c0_7, %c128_8] : memref<8x256xf32, #tpu.memory_space<vmem>>, vector<8x128xf32>
    %cst_9 = arith.constant 5.000000e-01 : f32
    %16 = vector.broadcast %cst_9 : f32 to vector<8x128xf32>
    %17 = arith.mulf %16, %14 : vector<8x128xf32>
    %18 = math.tanh %17 : vector<8x128xf32>
    %cst_10 = arith.constant 1.000000e+00 : f32
    %19 = vector.broadcast %cst_10 : f32 to vector<8x128xf32>
    %20 = arith.addf %18, %19 : vector<8x128xf32>
    %cst_11 = arith.constant 5.000000e-01 : f32
    %21 = vector.broadcast %cst_11 : f32 to vector<8x128xf32>
    %22 = arith.mulf %21, %20 : vector<8x128xf32>
    %23 = arith.mulf %22, %15 : vector<8x128xf32>
    %24 = arith.addf %22, %15 : vector<8x128xf32>
    %25 = arith.addf %12, %23 : vector<8x128xf32>
    %26 = arith.addf %13, %24 : vector<8x128xf32>
    %c0_12 = arith.constant 0 : index
    %c0_13 = arith.constant 0 : index
    %27 = vector.load %arg6[%c0_12, %c0_13] : memref<8x128xf32, #tpu.memory_space<vmem>>, vector<8x128xf32>
    %28 = arith.addf %27, %25 : vector<8x128xf32>
    %c0_14 = arith.constant 0 : index
    %c0_15 = arith.constant 0 : index
    %29 = vector.load %arg6[%c0_14, %c0_15] : memref<8x128xf32, #tpu.memory_space<vmem>>, vector<8x128xf32>
    tpu.vector_store %arg6[%c0_14, %c0_15], %28 {strides = array<i32>} : memref<8x128xf32, #tpu.memory_space<vmem>>, vector<8x128xf32>,
    %c0_16 = arith.constant 0 : index
    %c0_17 = arith.constant 0 : index
    %30 = vector.load %arg7[%c0_16, %c0_17] : memref<8x128xf32, #tpu.memory_space<vmem>>, vector<8x128xf32>
    %31 = arith.addf %30, %26 : vector<8x128xf32>
    %c0_18 = arith.constant 0 : index
    %c0_19 = arith.constant 0 : index
    %32 = vector.load %arg7[%c0_18, %c0_19] : memref<8x128xf32, #tpu.memory_space<vmem>>, vector<8x128xf32>
    tpu.vector_store %arg7[%c0_18, %c0_19], %31 {strides = array<i32>} : memref<8x128xf32, #tpu.memory_space<vmem>>, vector<8x128xf32>,
    %c0_i32_20 = arith.constant 0 : i32
    %33 = arith.cmpi eq, %arg1, %c0_i32_20 : i32
    %34 = arith.extui %33 : i1 to i32
    %c0_i32_21 = arith.constant 0 : i32
    %35 = arith.cmpi ne, %34, %c0_i32_21 : i32
    scf.if %35 {
      %c0_22 = arith.constant 0 : index
      %c0_23 = arith.constant 0 : index
      %36 = vector.load %arg6[%c0_22, %c0_23] : memref<8x128xf32, #tpu.memory_space<vmem>>, vector<8x128xf32>
      %cst_24 = arith.constant dense<0.000000e+00> : vector<8xf32>
      %37 = vector.multi_reduction <add>, %36, %cst_24 [1] : vector<8x128xf32> to vector<8xf32>
      %38 = vector.shape_cast %37 : vector<8xf32> to vector<8x1xf32>
      %c0_25 = arith.constant 0 : index
      %c0_26 = arith.constant 0 : index
      %39 = vector.load %arg4[%c0_25, %c0_26] : memref<8x1xf32, #tpu.memory_space<vmem>>, vector<8x1xf32>
      tpu.vector_store %arg4[%c0_25, %c0_26], %38 {strides = array<i32>} : memref<8x1xf32, #tpu.memory_space<vmem>>, vector<8x1xf32>,
      %c0_27 = arith.constant 0 : index
      %c0_28 = arith.constant 0 : index
      %40 = vector.load %arg7[%c0_27, %c0_28] : memref<8x128xf32, #tpu.memory_space<vmem>>, vector<8x128xf32>
      %cst_29 = arith.constant dense<0.000000e+00> : vector<8xf32>
      %41 = vector.multi_reduction <add>, %40, %cst_29 [1] : vector<8x128xf32> to vector<8xf32>
      %42 = vector.shape_cast %41 : vector<8xf32> to vector<8x1xf32>
      %c0_30 = arith.constant 0 : index
      %c0_31 = arith.constant 0 : index
      %43 = vector.load %arg5[%c0_30, %c0_31] : memref<8x1xf32, #tpu.memory_space<vmem>>, vector<8x1xf32>
      tpu.vector_store %arg5[%c0_30, %c0_31], %42 {strides = array<i32>} : memref<8x1xf32, #tpu.memory_space<vmem>>, vector<8x1xf32>,
    } else {
    }
    return
  }
  func.func @transform_0(%arg0: i32, %arg1: i32) -> (i32, i32) {
    %c0_i32 = arith.constant 0 : i32
    return %arg0, %arg1 : i32, i32
  }
  func.func @transform_1(%arg0: i32, %arg1: i32) -> (i32, i32) {
    %c0_i32 = arith.constant 0 : i32
    return %arg0, %arg1 : i32, i32
  }
  func.func @transform_2(%arg0: i32, %arg1: i32) -> (i32, i32) {
    %c0_i32 = arith.constant 0 : i32
    %c0_i32_0 = arith.constant 0 : i32
    return %arg0, %c0_i32 : i32, i32
  }
  func.func @transform_3(%arg0: i32, %arg1: i32) -> (i32, i32) {
    %c0_i32 = arith.constant 0 : i32
    %c0_i32_0 = arith.constant 0 : i32
    return %arg0, %c0_i32 : i32, i32
  }
}

</mosaic_0001>

<bundles_post_ra>
// kernel: iou_loss.1
= control target key start
LH: loop header
LB: loop body
LE: loop exit
PB: predicated region body
PF: predicated region fallthrough
CT: control target
= control target key end

     0   :  { %vm49_vm0 = vcmask 7168   ;;  %s105_s0 = inlined_call_operand.vmem [shape: f32[8,256], index: 0, kind: input, shape index: {}]   ;;  %s106_s1 = inlined_call_operand.vmem [shape: f32[8,256], index: 1, kind: input, shape index: {}]   ;;  %s107_s2 = inlined_call_operand.vmem [shape: f32[8,1], index: 2, kind: output, shape index: {0}]   ;;  %s108_s3 = inlined_call_operand.vmem [shape: f32[8,1], index: 3, kind: output, shape index: {1}]  }
   0x1   :  { %v19_v0 = vld [vmem:[%s105_s0] sm:$0xff]  ;;  %v27_v1 = vld [vmem:[%s105_s0 + $0x8] sm:$0xff] }
   0x2   :  { %v21_v2 = vmul.f32 0.5, %v19_v0  ;;  %v29_v3 = vmul.f32 0.5, %v27_v1  ;;  %v20_v7 = vld [vmem:[%s106_s1] sm:$0xff]  ;;  %v28_v10 = vld [vmem:[%s106_s1 + $0x8] sm:$0xff] }
   0x4   :  { %63 = vtanh.f32 %v21_v2 }
   0x5   :  { %65 = vtanh.f32 %v29_v3 }
  0x11   :  { %v64_v4 = vpop.eup %63 }
  0x12   :  { %v66_v5 = vpop.eup %65  ;;  %v23_v6 = vadd.f32 1.0, %v64_v4 }
  0x13   :  { %v31_v8 = vadd.f32 1.0, %v66_v5 }
  0x14   :  { %v24_v9 = vmul.f32 0.5, %v23_v6 }
  0x15   :  { %v32_v11 = vmul.f32 0.5, %v31_v8 }
  0x16   :  { %v25_v12 = vmul.f32 %v24_v9, %v20_v7  ;;  %v26_v14 = vadd.f32 %v24_v9, %v20_v7 }
  0x17   :  { %v33_v13 = vmul.f32 %v32_v11, %v28_v10  ;;  %v34_v15 = vadd.f32 %v32_v11, %v28_v10 }
  0x19   :  { %v35_v16 = vadd.f32 %v33_v13, %v25_v12  ;;  %v36_v17 = vadd.f32 %v34_v15, %v26_v14 }
  0x1b   :  { %47 = vadd.xlane.f32.xlu0 %v35_v16 }
  0x1f   :  { %52 = vadd.xlane.f32.xlu0 %v36_v17 }
  0xa4   :  { %v48_v18 = vpop.xlane.xlu0 %47 }
  0xa5   :  { %50 = vst.msk [vmem:[%s107_s2] sm:$0xff] %vm49_vm0, %v48_v18 }
  0xa8   :  { %v53_v19 = vpop.xlane.xlu0 %52 }
  0xa9   :  { %54 = vst.msk [vmem:[%s108_s3] sm:$0xff] %vm49_vm0, %v53_v19 }

</bundles_post_ra>
